<compile_context>
chip_gen: v7x
topology: tpu7x:2x2x1
jax: 0.10.0
libtpu: 0.0.40
codegen_flags: <defaults>
</compile_context>

<pallas_src>
import jax
import jax.numpy as jnp
import numpy as np
from jax.experimental import pallas as pl
from jax.experimental.pallas import tpu as pltpu

# Sublane tile of the (sublane, 128) vreg tiling, per element byte-width.
_SUBLANE_TILE = {4: 8, 2: 16, 1: 32}

# Target bytes per pipeline block (~2 MiB keeps the copy near the HBM
# roofline without bloating VMEM).
_TARGET_BLOCK_BYTES = 2 * 1024 * 1024

# VMEM budget for the 4 pipeline buffers (2x double-buffered input +
# 2x double-buffered output).  Conservative so it also fits v7x (64 MiB
# physical VMEM); the explicit limit is passed to the compiler.
_VMEM_BUDGET_BYTES = 24 * 1024 * 1024
_VMEM_LIMIT_BYTES = 32 * 1024 * 1024


def _copy_kernel(x_ref, o_ref):
    # Pure streaming copy; body is a bare whole-tile load + store.
    o_ref[...] = x_ref[...]


def _row_tile(rows, cols, itemsize, row_tile_target=None):
    """Pick a row tile: sublane-aligned, VMEM-budgeted, exact divisor of rows."""
    sub = _SUBLANE_TILE.get(itemsize, 8)
    row_bytes = max(cols * itemsize, 1)
    if row_tile_target is None:
        # Aim for ~_TARGET_BLOCK_BYTES per block.
        row_tile_target = max(sub, _TARGET_BLOCK_BYTES // row_bytes)
    # Cap so 2x input + 2x output blocks fit the VMEM budget.
    cap = max(sub, _VMEM_BUDGET_BYTES // (4 * row_bytes))
    t = min(rows, int(row_tile_target), int(cap))
    t = max(sub, (t // sub) * sub)
    # Prefer an exact divisor of rows (rows is a multiple of sub by
    # construction) so no masked partial blocks are generated.
    for tb in range(t, sub - 1, -sub):
        if rows % tb == 0:
            return tb
    return min(t, rows)  # unreachable when rows % sub == 0


def seq_embeddings_all_to_one_copy(x, row_tile_target=None):
    """Device-local analogue of one fbgemm all_to_one_device tensor copy.

    Row-tiled, double-buffered HBM->VMEM->HBM streaming copy of `x`,
    returning a fresh array (the tensor as it would appear after being moved
    to the target device).
    """
    orig_shape = x.shape
    if x.ndim == 1:
        x2 = x.reshape(1, -1)
    elif x.ndim == 2:
        x2 = x
    else:
        # Flatten leading dims into the row axis; last dim stays on lanes.
        x2 = x.reshape(-1, x.shape[-1])

    rows, cols = x2.shape
    itemsize = jnp.dtype(x2.dtype).itemsize
    sub = _SUBLANE_TILE.get(itemsize, 8)

    # Sublane guard: pad rows up to the dtype's sublane tile only if needed.
    pad = (-rows) % sub
    if pad:
        # TODO(synk): ragged row counts cost one pad + one slice copy outside
        # the kernel; embedding row counts are normally sublane-aligned.
        x2 = jnp.pad(x2, ((0, pad), (0, 0)))
    prows = rows + pad

    tb = _row_tile(prows, cols, itemsize, row_tile_target)
    grid = (prows // tb,)  # exact: tb divides prows

    out = pl.pallas_call(
        _copy_kernel,
        grid=grid,
        in_specs=[pl.BlockSpec((tb, cols), lambda i: (i, 0))],
        out_specs=pl.BlockSpec((tb, cols), lambda i: (i, 0)),
        out_shape=jax.ShapeDtypeStruct((prows, cols), x2.dtype),
        compiler_params=pltpu.CompilerParams(
            dimension_semantics=("parallel",),
            vmem_limit_bytes=_VMEM_LIMIT_BYTES,
        ),
        cost_estimate=pl.CostEstimate(
            flops=0,
            transcendentals=0,
            bytes_accessed=2 * prows * cols * itemsize,
        ),
    )(x2)

    if pad:
        out = out[:rows]
    return out.reshape(orig_shape)


class SeqEmbeddingsAllToOne:
    """JAX/Pallas analogue of torchrec SeqEmbeddingsAllToOne.

    `device` is the target jax.Device (plays the role of torch.device);
    `world_size` is the number of source devices / input tensors.
    """

    def __init__(self, device=None, world_size=1):
        self._device = device
        self._world_size = world_size

    def forward(self, tensors, row_tile_target=None):
        assert len(tensors) == self._world_size
        outs = []
        for t in tensors:
            if self._device is not None:
                # No-op on a single device; the real cross-device hop is the
                # untranslatable part (see module-level TODO).
                t = jax.device_put(t, self._device)
            outs.append(seq_embeddings_all_to_one_copy(t, row_tile_target))
        # torch returns NoWait(list) (already materialized); same list here.
        return outs

    __call__ = forward


if __name__ == "__main__":
    # Small, TPU-friendly shapes: 4 "source devices", mixed row counts /
    # feature widths / dtypes (sequence embeddings are [num_ids, emb_dim]).
    world_size = 4
    key = jax.random.PRNGKey(0)
    keys = jax.random.split(key, world_size)
    tensors = [
        jax.random.normal(keys[0], (256, 256), jnp.float32),
        jax.random.normal(keys[1], (128, 256), jnp.float32),
        jax.random.normal(keys[2], (192, 128), jnp.float32),
        jax.random.normal(keys[3], (96, 512), jnp.float32).astype(jnp.bfloat16),
    ]

    module = SeqEmbeddingsAllToOne(device=jax.devices()[0],
                                   world_size=world_size)
    # Small row_tile_target so even these small demo shapes exercise a
    # multi-step pipelined grid (production default is the auto ~2 MiB tile).
    outs = module(tensors, row_tile_target=64)
    outs = jax.block_until_ready(outs)

    # Reference: all_to_one_device is a pure copy -> outputs must be bit-exact.
    for t, o in zip(tensors, outs):
        assert o.shape == t.shape and o.dtype == t.dtype
        np.testing.assert_array_equal(
            np.asarray(o.astype(jnp.float32)),
            np.asarray(t.astype(jnp.float32)),
        )

    print("KERNEL_OK")
</pallas_src>

<mosaic_0001>
module attributes {stable_mosaic.version = 11 : i64} {
  func.func @_copy_kernel(%arg0: i32, %arg1: memref<64x256xf32, #tpu.memory_space<vmem>>, %arg2: memref<64x256xf32, #tpu.memory_space<vmem>>) attributes {dimension_semantics = [#tpu.dimension_semantics<parallel>], iteration_bounds = array<i64: 4>, scalar_prefetch = 0 : i64, scratch_operands = 0 : i64, tpu.core_type = #tpu.core_type<tc>, window_params = [{transform_indices = @transform_0, window_bounds = array<i64: 64, 256>}, {transform_indices = @transform_1, window_bounds = array<i64: 64, 256>}]} {
    %c0 = arith.constant 0 : index
    %c0_0 = arith.constant 0 : index
    %0 = vector.load %arg1[%c0, %c0_0] : memref<64x256xf32, #tpu.memory_space<vmem>>, vector<64x256xf32>
    %c0_1 = arith.constant 0 : index
    %c0_2 = arith.constant 0 : index
    %1 = vector.load %arg2[%c0_1, %c0_2] : memref<64x256xf32, #tpu.memory_space<vmem>>, vector<64x256xf32>
    tpu.vector_store %arg2[%c0_1, %c0_2], %0 {strides = array<i32>} : memref<64x256xf32, #tpu.memory_space<vmem>>, vector<64x256xf32>,
    return
  }
  func.func @transform_0(%arg0: i32) -> (i32, i32) {
    %c0_i32 = arith.constant 0 : i32
    %c0_i32_0 = arith.constant 0 : i32
    return %arg0, %c0_i32 : i32, i32
  }
  func.func @transform_1(%arg0: i32) -> (i32, i32) {
    %c0_i32 = arith.constant 0 : i32
    %c0_i32_0 = arith.constant 0 : i32
    return %arg0, %c0_i32 : i32, i32
  }
}

</mosaic_0001>

<bundles_post_ra>
// kernel: tpu_custom_call.1
= control target key start
LH: loop header
LB: loop body
LE: loop exit
PB: predicated region body
PF: predicated region fallthrough
CT: control target
= control target key end

     0   :  { %6 = vsyncpa [#allocation3], 0  ;;  %s639_s0 = inlined_call_operand.hbm [shape: f32[256,256], index: 0, kind: input, shape index: {}]   ;;  %s640_s1 = inlined_call_operand.hbm [shape: f32[256,256], index: 1, kind: output, shape index: {}]  }
   0x1   :  { %8 = vsyncpa [#allocation3 + $0x1], 0 }
   0x2   :  { %9 = vsyncpa [#allocation4], 0 }
   0x3   :  { %11 = vsyncpa [#allocation4 + $0x1], 0  ;;  %s442_s6 = smov 0   ;;  %s444_s7 = smov 0  }
   0x4   :  { %s446_s8 = smov 0   ;;  %s448_s9 = smov 0  }
   0x5 LB: > { %s463_s10 = sadd.s32 4294967295, %s424_s9   ;;  %s258_s11 = sadd.s32 4294967294, %s424_s9   ;;  %s424_s9 = sphi %s448_s9, %s652_s9   ;;  %s420_s8 = sphi %s446_s8, %s651_s8   ;;  %s416_s7 = sphi %s444_s7, %s650_s7   ;;  %s412_s6 = sphi %s442_s6, %s649_s6  }
   0x6   : > { %s467_s12 = sadd.s32 1, %s424_s9   ;;  %s24_s13 = sadd.s32 1, %s420_s8 }
   0x7   : > { %s21_s14 = ssub.s32 %s424_s9, %s467_s12  ;;  %p31_p0 = scmp.ne.s32.totalorder %s420_s8, %s416_s7 }
   0x8   : > { %p22_p1 = scmp.eq.s32.totalorder %s21_s14, 0  ;;  %p32_p2 = scmp.eq.s32.totalorder %s424_s9, 0 }
   0x9   : > { %p37_p3 = scmp.ne.s32.totalorder %s416_s7, %s412_s6  ;;  %p38_p4 = scmp.eq.s32.totalorder %s463_s10, 0 }
   0xa   : > { %s479_s15 = scalar_select %p22_p1, %s420_s8, %s24_s13  }
   0xb   : > { %p481_p5 = por %p32_p2, %p31_p0  ;;  %p485_p6 = por %p38_p4, %p37_p3 }
   0xc   : > { %p61_p7 = scmp.eq.s32.totalorder %s463_s10, 3  ;;  %p67_p8 = scmp.eq.s32.totalorder %s258_s11, 3 }
   0xd   : > { %p290_p9 = scmp.lt.s32.totalorder %s424_s9, 4  ;;  %s87_s20 = sand.u32 1, %s420_s8  }
   0xe   : > { %p491_p10 = por %p61_p7, %p31_p0  ;;  %p495_p11 = por %p67_p8, %p37_p3 }
   0xf   : > { %s275_s21 = sshll.u32 %s424_s9, 11  ;;  %s261_s22 = sshll.u32 %s87_s20, 7 }
  0x10   : > { %s644_s18 = scalar_select %p491_p10, 1, 0 }
  0x11   : > { %s645_s19 = scalar_select %p495_p11, 1, 0 }
  0x12   : > { %s504_s25 = scalar_lea.hbm %s639_s0, %s275_s21  ;;  %s91_s26 = scalar_lea.vmem [#allocation2], %s261_s22 }
  0x13   : > { %s99_s27 = sshll.u32 %s91_s26, 4  ;;  %p508_p12 = pnand %p290_p9, %p481_p5  ;;  %s512_s27 = int_to_ptr.vmem [resolvable:$true] %s99_s27 }
  0x14   : > { %s514_s29 = scalar_lea.sflag [#allocation3], %s87_s20  ;;  %s328_s30 = scalar_lea.hbm %s504_s25, 2048 }
  0x15   : > { %p329_p13 = scmp.ne.s32.totalorder %s504_s25, %s328_s30  ;;  %p330_p0 = pneg %p508_p12 }
  0x16   : > { %s333_s4 = scalar_lea.hbm %s639_s0, 8192  ;;  %p334_p3 = scmp.lt.u32.totalorder %s504_s25, %s639_s0 }
  0x17   : > { %p331_p1 = pnand %p330_p0, %p329_p13  ;;  %p335_p4 = scmp.lt.u32.totalorder %s333_s4, %s328_s30 }
  0x18   : > { %p337_p7 = scmp.lt.u32.totalorder %s328_s30, %s504_s25 }
  0x19   : > { %p332_p2 = pneg %p331_p1  ;;  %p336_p5 = por %p335_p4, %p334_p3 }
  0x1b   : > { %p338_p8 = por %p337_p7, %p336_p5 }
  0x1d   : > { %p339_p9 = pnand %p338_p8, %p332_p2 }
  0x1f   : > { %342 = shalt.err (!%p339_p9)
}
  0x20   : > { %s343_s13 = scalar_lea.vmem %s512_s27, 2048  ;;  %s426_s14 = smov [#allocation2]  }
  0x21   : > { %p344_p13 = scmp.ne.s32.totalorder %s512_s27, %s343_s13  ;;  %s348_s16 = sshll.u32 %s426_s14, 4  ;;  %s349_s16 = int_to_ptr.vmem [resolvable:$false] %s348_s16 }
  0x22   : > { %s350_s20 = scalar_lea.vmem %s349_s16, 4096  ;;  %p351_p10 = scmp.lt.s32.totalorder %s512_s27, %s349_s16 }
  0x23   : > { %p346_p1 = pnand %p344_p13, %p330_p0  ;;  %p352_p3 = scmp.lt.s32.totalorder %s350_s20, %s343_s13 }
  0x25   : > { %p347_p11 = pneg %p346_p1  ;;  %p353_p4 = por %p352_p3, %p351_p10 }
  0x27   : > { %p354_p5 = pnand %p353_p4, %p347_p11 }
  0x29   : > { %357 = shalt.err (!%p354_p5)
}
  0x2a   : > { %s427_s21 = smov 256   ;;  %s428_s22 = smov 16  }
  0x2b   : > { %285 = dma.hbm_to_vmem [thread:$0]  (!%p508_p12), %s504_s25, 2048, %s512_s27, %s514_s29, %s427_s21, %s427_s21, %s428_s22  }
  0x2c   : > { %p265_p0 = scmp.ge.s32.totalorder %s424_s9, 1  ;;  %p107_p2 = scmp.lt.s32.totalorder %s424_s9, 5 }
  0x2e   : > { %p108_p7 = pnand %p265_p0, %p107_p2 }
  0x2f   : > { %s545_s23 = sand.u32 (!%p108_p7), 1, %s416_s7  }
  0x30   : > { %111 = sbr.rel (%p108_p7) target bundleno = 83 (0x53), region = 24  ;;  %s266_s24 = sshll.u32 (!%p108_p7), %s545_s23, 7 }
  0x31   : > { %s114_s26 = scalar_lea.sflag (!%p108_p7), [#allocation3], %s545_s23  ;;  %s549_s30 = scalar_lea.vmem (!%p108_p7), [#allocation2], %s266_s24 }
  0x37   : > { %403 = dma.done.wait (%p485_p6), %s114_s26, 2048  }
  0x38   : > { %405 = vsyncadd (%p485_p6), %s114_s26, 4294965248  ;;  %v138_v0 = vld [vmem:[%s549_s30] sm:$0xff]  ;;  %v139_v1 = vld [vmem:[%s549_s30 + $0x8] sm:$0xff]  ;;  %s277_s25 = sshll.u32 %s463_s10, 11  ;;  %s559_s27 = scalar_lea.vmem [#allocation5], %s266_s24 }
  0x39   : > { %v140_v2 = vld [vmem:[%s549_s30 + $0x10] sm:$0xff]  ;;  %s185_s17 = sshll.u32 %s559_s27, 4  ;;  %154 = vst [vmem:[%s559_s27] sm:$0xff] %v138_v0  ;;  %155 = vst [vmem:[%s559_s27 + $0x8] sm:$0xff] %v139_v1  ;;  %v141_v3 = vld [vmem:[%s549_s30 + $0x18] sm:$0xff]  ;;  %s583_s29 = scalar_lea.hbm %s640_s1, %s277_s25  ;;  %s585_s17 = int_to_ptr.vmem [resolvable:$true] %s185_s17 }
  0x3a   : > { %156 = vst [vmem:[%s559_s27 + $0x10] sm:$0xff] %v140_v2  ;;  %v142_v4 = vld [vmem:[%s549_s30 + $0x20] sm:$0xff]  ;;  %v143_v5 = vld [vmem:[%s549_s30 + $0x28] sm:$0xff]  ;;  %157 = vst [vmem:[%s559_s27 + $0x18] sm:$0xff] %v141_v3  ;;  %s171_s2 = scalar_lea.sflag [#allocation4], %s545_s23  ;;  %s358_s3 = scalar_lea.vmem %s585_s17, 2048 }
  0x3b   : > { %158 = vst [vmem:[%s559_s27 + $0x20] sm:$0xff] %v142_v4  ;;  %159 = vst [vmem:[%s559_s27 + $0x28] sm:$0xff] %v143_v5  ;;  %v144_v6 = vld [vmem:[%s549_s30 + $0x30] sm:$0xff]  ;;  %v145_v7 = vld [vmem:[%s549_s30 + $0x38] sm:$0xff]  ;;  %p359_p6 = scmp.ne.s32.totalorder %s585_s17, %s358_s3  ;;  %p647_p10 = scmp.ne.s32.totalorder %s644_s18, 0 }
  0x3c   : > { %v146_v8 = vld [vmem:[%s549_s30 + $0x40] sm:$0xff]  ;;  %160 = vst [vmem:[%s559_s27 + $0x30] sm:$0xff] %v144_v6  ;;  %161 = vst [vmem:[%s559_s27 + $0x38] sm:$0xff] %v145_v7  ;;  %v147_v9 = vld [vmem:[%s549_s30 + $0x48] sm:$0xff]  ;;  %s429_s4 = smov [#allocation5]  }
  0x3d   : > { %162 = vst [vmem:[%s559_s27 + $0x40] sm:$0xff] %v146_v8  ;;  %v148_v10 = vld [vmem:[%s549_s30 + $0x50] sm:$0xff]  ;;  %v149_v11 = vld [vmem:[%s549_s30 + $0x58] sm:$0xff]  ;;  %163 = vst [vmem:[%s559_s27 + $0x48] sm:$0xff] %v147_v9  ;;  %p360_p11 = pnand %p359_p6, %p647_p10  ;;  %s362_s5 = sshll.u32 %s429_s4, 4  ;;  %s363_s5 = int_to_ptr.vmem [resolvable:$false] %s362_s5 }
  0x3e   : > { %164 = vst [vmem:[%s559_s27 + $0x50] sm:$0xff] %v148_v10  ;;  %165 = vst [vmem:[%s559_s27 + $0x58] sm:$0xff] %v149_v11  ;;  %v150_v12 = vld [vmem:[%s549_s30 + $0x60] sm:$0xff]  ;;  %v151_v13 = vld [vmem:[%s549_s30 + $0x68] sm:$0xff]  ;;  %s364_s11 = scalar_lea.vmem %s363_s5, 4096  ;;  %p365_p8 = scmp.lt.s32.totalorder %s585_s17, %s363_s5 }
  0x3f   : > { %v152_v14 = vld [vmem:[%s549_s30 + $0x70] sm:$0xff]  ;;  %166 = vst [vmem:[%s559_s27 + $0x60] sm:$0xff] %v150_v12  ;;  %167 = vst [vmem:[%s559_s27 + $0x68] sm:$0xff] %v151_v13  ;;  %v153_v15 = vld [vmem:[%s549_s30 + $0x78] sm:$0xff]  ;;  %p361_p12 = pneg %p360_p11  ;;  %p366_p9 = scmp.lt.s32.totalorder %s364_s11, %s358_s3 }
  0x40   : > { %168 = vst [vmem:[%s559_s27 + $0x70] sm:$0xff] %v152_v14  ;;  %169 = vst [vmem:[%s559_s27 + $0x78] sm:$0xff] %v153_v15 }
  0x41   : > { %p367_p13 = por %p366_p9, %p365_p8 }
  0x43   : > { %p368_p1 = pnand %p367_p13, %p361_p12 }
  0x45   : > { %371 = shalt.err (!%p368_p1)
}
  0x46   : > { %s372_s13 = scalar_lea.hbm %s583_s29, 2048  ;;  %s376_s20 = scalar_lea.hbm %s640_s1, 8192 }
  0x47   : > { %p373_p3 = scmp.ne.s32.totalorder %s583_s29, %s372_s13  ;;  %p377_p0 = scmp.lt.u32.totalorder %s583_s29, %s640_s1 }
  0x48   : > { %p378_p2 = scmp.lt.u32.totalorder %s376_s20, %s372_s13  ;;  %p380_p6 = scmp.lt.u32.totalorder %s372_s13, %s583_s29 }
  0x49   : > { %p374_p4 = pnand %p373_p3, %p647_p10 }
  0x4a   : > { %p379_p7 = por %p378_p2, %p377_p0 }
  0x4b   : > { %p375_p5 = pneg %p374_p4 }
  0x4c   : > { %p381_p11 = por %p380_p6, %p379_p7 }
  0x4e   : > { %p382_p12 = pnand %p381_p11, %p375_p5 }
  0x50   : > { %385 = shalt.err (!%p382_p12)
}
  0x51   : > { %s430_s24 = smov 256   ;;  %s431_s26 = smov 16  }
  0x52   : > { %280 = dma.vmem_to_hbm [thread:$0]  (%p647_p10), %s585_s17, 2048, %s583_s29, %s171_s2, %s430_s24, %s430_s24, %s431_s26  }
  0x53 PF: > { %p291_p8 = scmp.ge.s32.totalorder %s424_s9, 2  ;;  %s200_s30 = sand.u32 1, %s412_s6  }
  0x54   : > { %p648_p9 = scmp.ne.s32.totalorder %s645_s19, 0  ;;  %s201_s25 = scalar_lea.sflag [#allocation4], %s200_s30 }
  0x56   : > { %p287_p13 = pnand %p291_p8, %p648_p9 }
  0x58   : > { %407 = dma.done.wait (!%p287_p13), %s201_s25, 2048  }
  0x59   : > { %409 = vsyncadd (!%p287_p13), %s201_s25, 4294965248  ;;  %p14_p1 = scmp.ge.s32.totalorder %s467_s12, 6   ;;  %s649_s6 = smov %s416_s7 }
  0x5a   : > { %s650_s7 = smov %s420_s8  ;;  %s651_s8 = smov %s479_s15 }
  0x5b   : > { %s652_s9 = smov %s467_s12  ;;  %16 = sbr.rel (!%p14_p1) target bundleno = 5 (0x5), region = 69 }
  0x62   :  { %206 = vsyncpa [#allocation3], 1 }
  0x63   :  { %208 = vsyncpa [#allocation3 + $0x1], 1 }
  0x64   :  { %209 = vsyncpa [#allocation4], 1 }
  0x65   :  { %211 = vsyncpa [#allocation4 + $0x1], 1 }

</bundles_post_ra>
